<compile_context>
chip_gen: v7x
topology: tpu7x:2x2x1
jax: 0.10.0
libtpu: 0.0.40
codegen_flags: <defaults>
</compile_context>

<pallas_src>
from functools import partial

import jax
import jax.numpy as jnp
import numpy as np
from jax import lax
from jax.experimental import pallas as pl
from jax.experimental.pallas import tpu as pltpu


def _self_attention_kernel(x_ref, w_ref, b_ref, gamma_ref, o_ref, *, hw, c8):
    """One grid step: BT batches, x block is (BT*hw, C) rows of (pixel, chan)."""
    rows, C = x_ref.shape
    bt = rows // hw

    x = x_ref[...].astype(jnp.float32)                                  # (rows, C)

    # Fused q/k/v projection: one (rows, C) @ (C, 2*C8+C) MXU matmul + bias.
    qkv = jnp.dot(x, w_ref[...], preferred_element_type=jnp.float32) + b_ref[...]
    q_all = qkv[:, :c8]                                                  # (rows, C8)
    k_all = qkv[:, c8:2 * c8]                                            # (rows, C8)
    v_all = qkv[:, 2 * c8:]                                              # (rows, C)

    gamma = gamma_ref[0, 0]

    # Attention is independent per batch element -> small static loop over the
    # BT sub-batches inside this block (bt is tiny, <= 128 // HW).
    for t in range(bt):
        r0 = t * hw
        q = q_all[r0:r0 + hw]                                            # (hw, C8)
        k = k_all[r0:r0 + hw]                                            # (hw, C8)
        v = v_all[r0:r0 + hw]                                            # (hw, C)
        x_t = x[r0:r0 + hw]                                              # (hw, C)

        # energy[i, j] = <q_i, k_j>; contract shared last dim, no k.T.
        e = lax.dot_general(q, k,
                            dimension_numbers=(((1,), (1,)), ((), ())),
                            preferred_element_type=jnp.float32)          # (hw, hw)

        # Softmax over keys; normalize the (hw, C) output instead of the
        # (hw, hw) matrix, using an EUP reciprocal + one Newton refinement.
        m = jnp.max(e, axis=-1, keepdims=True)
        p = jnp.exp(e - m)
        l = jnp.sum(p, axis=-1, keepdims=True)                           # (hw, 1)
        o = jnp.dot(p, v, preferred_element_type=jnp.float32)            # (hw, C)
        inv = pl.reciprocal(l, approx=True)
        inv = inv * (2.0 - l * inv)                                      # Newton step

        o_ref[r0:r0 + hw, :] = (gamma * (o * inv) + x_t).astype(o_ref.dtype)


def self_attention_pallas(x_nchw, wq, bq, wk, bk, wv, bv, gamma):
    """x_nchw: (B, C, H, W) float32 (or (B, C), which gets H = W = 1)."""
    if x_nchw.ndim == 2:
        x_nchw = x_nchw[:, :, None, None]
    B, C, H, W = x_nchw.shape
    HW = H * W
    C8 = wq.shape[0]
    Nf = 2 * C8 + C

    # Pre-transpose + fuse the three 1x1-conv weights once, wrapper side:
    #   qkv = x @ [Wq^T | Wk^T | Wv^T] + [bq | bk | bv]
    w_fused = jnp.concatenate([wq.T, wk.T, wv.T], axis=1).astype(jnp.float32)   # (C, Nf)
    b_fused = jnp.concatenate([bq, bk, bv]).astype(jnp.float32).reshape(1, Nf)  # (1, Nf)
    gamma2d = jnp.reshape(gamma.astype(jnp.float32), (1, 1))

    # NCHW -> rows of (pixel, channel): (B*HW, C), contiguous per batch.
    x_rows = jnp.transpose(x_nchw, (0, 2, 3, 1)).reshape(B * HW, C)

    # Batch-tile: BT batches per grid step so each step feeds ~128 MXU rows.
    BT = max(1, min(B, max(1, 128 // HW)))
    if (BT * HW) % 8 != 0:
        BT = B  # full-array block is always a legal BlockSpec
    NB = pl.cdiv(B, BT)
    Bp = NB * BT
    if Bp != B:  # pad ragged batch tile with zeros (sliced off afterwards)
        x_rows = jnp.pad(x_rows, ((0, (Bp - B) * HW), (0, 0)))

    rows_per_step = BT * HW
    kernel = partial(_self_attention_kernel, hw=HW, c8=C8)

    out = pl.pallas_call(
        kernel,
        out_shape=jax.ShapeDtypeStruct((Bp * HW, C), x_rows.dtype),
        grid_spec=pltpu.PrefetchScalarGridSpec(
            num_scalar_prefetch=0,
            grid=(NB,),
            in_specs=[
                pl.BlockSpec((rows_per_step, C), lambda b: (b, 0)),      # x rows
                pl.BlockSpec((C, Nf), lambda b: (0, 0)),                 # fused W^T
                pl.BlockSpec((1, Nf), lambda b: (0, 0)),                 # fused bias
                pl.BlockSpec(memory_space=pltpu.MemorySpace.SMEM),       # gamma
            ],
            out_specs=pl.BlockSpec((rows_per_step, C), lambda b: (b, 0)),
        ),
        compiler_params=pltpu.CompilerParams(
            dimension_semantics=("parallel",)),
    )(x_rows, w_fused, b_fused, gamma2d)

    out = out[:B * HW]
    return jnp.transpose(out.reshape(B, H, W, C), (0, 3, 1, 2))


def _reference(x_nchw, wq, bq, wk, bk, wv, bv, gamma):
    """Pure-JAX transcription of the PyTorch forward (NCHW)."""
    if x_nchw.ndim == 2:
        x_nchw = x_nchw[:, :, None, None]
    B, C, H, W = x_nchw.shape
    xf = x_nchw.reshape(B, C, H * W)
    q = jnp.einsum('oc,bcn->bon', wq, xf) + bq[None, :, None]
    k = jnp.einsum('oc,bcn->bon', wk, xf) + bk[None, :, None]
    v = jnp.einsum('oc,bcn->bon', wv, xf) + bv[None, :, None]
    energy = jnp.einsum('boi,boj->bij', q, k)                 # (B, HW, HW)
    attn = jax.nn.softmax(energy, axis=-1)
    out = jnp.einsum('bcj,bij->bci', v, attn).reshape(B, C, H, W)
    return gamma * out + x_nchw


if __name__ == "__main__":
    key = jax.random.PRNGKey(0)
    B, C, H, W = 4, 32, 8, 8          # in_channels=32 -> C//8 = 4
    C8 = C // 8

    ks = jax.random.split(key, 7)
    x = jax.random.normal(ks[0], (B, C, H, W), jnp.float32)

    # Deterministic synthetic parameters (shapes match nn.Conv2d(.., 1)).
    wq = jax.random.normal(ks[1], (C8, C), jnp.float32) * 0.1
    bq = jax.random.normal(ks[2], (C8,), jnp.float32) * 0.1
    wk = jax.random.normal(ks[3], (C8, C), jnp.float32) * 0.1
    bk = jax.random.normal(ks[4], (C8,), jnp.float32) * 0.1
    wv = jax.random.normal(ks[5], (C, C), jnp.float32) * 0.1
    bv = jax.random.normal(ks[6], (C,), jnp.float32) * 0.1

    # 1) Module's actual init: gamma = 0 -> identity residual.
    gamma0 = jnp.zeros((), jnp.float32)
    out0 = jax.block_until_ready(
        self_attention_pallas(x, wq, bq, wk, bk, wv, bv, gamma0))
    ref0 = _reference(x, wq, bq, wk, bk, wv, bv, gamma0)
    np.testing.assert_allclose(np.asarray(out0), np.asarray(ref0),
                               rtol=1e-5, atol=1e-5)

    # 2) Nonzero gamma exercises the attention path.
    gamma1 = jnp.float32(0.5)
    out1 = jax.block_until_ready(
        self_attention_pallas(x, wq, bq, wk, bk, wv, bv, gamma1))
    ref1 = _reference(x, wq, bq, wk, bk, wv, bv, gamma1)
    np.testing.assert_allclose(np.asarray(out1), np.asarray(ref1),
                               rtol=1e-4, atol=1e-4)

    # 3) Odd batch size exercises the ragged batch-tile padding path.
    x3 = x[:3]
    out3 = jax.block_until_ready(
        self_attention_pallas(x3, wq, bq, wk, bk, wv, bv, gamma1))
    ref3 = _reference(x3, wq, bq, wk, bk, wv, bv, gamma1)
    np.testing.assert_allclose(np.asarray(out3), np.asarray(ref3),
                               rtol=1e-4, atol=1e-4)

    print("KERNEL_OK")
</pallas_src>

<mosaic_0001>
module attributes {stable_mosaic.version = 11 : i64} {
  func.func @_self_attention_kernel(%arg0: i32, %arg1: memref<128x32xf32, #tpu.memory_space<vmem>>, %arg2: memref<32x40xf32, #tpu.memory_space<vmem>>, %arg3: memref<1x40xf32, #tpu.memory_space<vmem>>, %arg4: memref<1x1xf32, #tpu.memory_space<smem>>, %arg5: memref<128x32xf32, #tpu.memory_space<vmem>>) attributes {dimension_semantics = [#tpu.dimension_semantics<parallel>], iteration_bounds = array<i64: 2>, scalar_prefetch = 0 : i64, scratch_operands = 0 : i64, tpu.core_type = #tpu.core_type<tc>, window_params = [{transform_indices = @transform_0, window_bounds = array<i64: 128, 32>}, {pipeline_mode = #tpu.pipeline_mode<synchronous>, transform_indices = @transform_1, window_bounds = array<i64: 32, 40>}, {pipeline_mode = #tpu.pipeline_mode<synchronous>, transform_indices = @transform_2, window_bounds = array<i64: 1, 40>}, {transform_indices = @transform_3, window_bounds = array<i64: 1, 1>}, {transform_indices = @transform_4, window_bounds = array<i64: 128, 32>}]} {
    %c0 = arith.constant 0 : index
    %c0_0 = arith.constant 0 : index
    %0 = vector.load %arg1[%c0, %c0_0] : memref<128x32xf32, #tpu.memory_space<vmem>>, vector<128x32xf32>
    %c0_1 = arith.constant 0 : index
    %c0_2 = arith.constant 0 : index
    %1 = vector.load %arg2[%c0_1, %c0_2] : memref<32x40xf32, #tpu.memory_space<vmem>>, vector<32x40xf32>
    %cst = arith.constant dense<0.000000e+00> : vector<128x40xf32>
    %2 = tpu.matmul %0, %1, %cst {dimension_numbers = #tpu.dot_dimension_numbers<[1], [0], [0], [1], [0, 0, 1, 1], [], []>} : vector<128x32xf32>, vector<32x40xf32>, vector<128x40xf32> -> vector<128x40xf32>
    %c0_3 = arith.constant 0 : index
    %c0_4 = arith.constant 0 : index
    %3 = vector.load %arg3[%c0_3, %c0_4] : memref<1x40xf32, #tpu.memory_space<vmem>>, vector<1x40xf32>
    %4 = vector.broadcast %3 : vector<1x40xf32> to vector<128x40xf32>
    %5 = arith.addf %2, %4 : vector<128x40xf32>
    %6 = vector.extract_strided_slice %5 {offsets = [0, 0], sizes = [128, 4], strides = [1, 1]} : vector<128x40xf32> to vector<128x4xf32>
    %7 = vector.extract_strided_slice %5 {offsets = [0, 4], sizes = [128, 4], strides = [1, 1]} : vector<128x40xf32> to vector<128x4xf32>
    %8 = vector.extract_strided_slice %5 {offsets = [0, 8], sizes = [128, 32], strides = [1, 1]} : vector<128x40xf32> to vector<128x32xf32>
    %c0_5 = arith.constant 0 : index
    %c0_6 = arith.constant 0 : index
    %9 = memref.load %arg4[%c0_5, %c0_6] : memref<1x1xf32, #tpu.memory_space<smem>>
    %10 = vector.extract_strided_slice %6 {offsets = [0, 0], sizes = [64, 4], strides = [1, 1]} : vector<128x4xf32> to vector<64x4xf32>
    %11 = vector.extract_strided_slice %7 {offsets = [0, 0], sizes = [64, 4], strides = [1, 1]} : vector<128x4xf32> to vector<64x4xf32>
    %12 = vector.extract_strided_slice %8 {offsets = [0, 0], sizes = [64, 32], strides = [1, 1]} : vector<128x32xf32> to vector<64x32xf32>
    %13 = vector.extract_strided_slice %0 {offsets = [0, 0], sizes = [64, 32], strides = [1, 1]} : vector<128x32xf32> to vector<64x32xf32>
    %cst_7 = arith.constant dense<0.000000e+00> : vector<64x64xf32>
    %14 = tpu.matmul %10, %11, %cst_7 {dimension_numbers = #tpu.dot_dimension_numbers<[1], [1], [0], [0], [0, 0, 1, 0], [], []>} : vector<64x4xf32>, vector<64x4xf32>, vector<64x64xf32> -> vector<64x64xf32>
    %cst_8 = arith.constant dense<0xFF800000> : vector<64xf32>
    %15 = vector.multi_reduction <maximumf>, %14, %cst_8 [1] : vector<64x64xf32> to vector<64xf32>
    %16 = vector.shape_cast %15 : vector<64xf32> to vector<64x1xf32>
    %17 = vector.broadcast %16 : vector<64x1xf32> to vector<64x64xf32>
    %18 = arith.subf %14, %17 : vector<64x64xf32>
    %19 = math.exp %18 : vector<64x64xf32>
    %cst_9 = arith.constant dense<0.000000e+00> : vector<64xf32>
    %20 = vector.multi_reduction <add>, %19, %cst_9 [1] : vector<64x64xf32> to vector<64xf32>
    %21 = vector.shape_cast %20 : vector<64xf32> to vector<64x1xf32>
    %cst_10 = arith.constant dense<0.000000e+00> : vector<64x32xf32>
    %22 = tpu.matmul %19, %12, %cst_10 {dimension_numbers = #tpu.dot_dimension_numbers<[1], [0], [0], [1], [0, 0, 1, 1], [], []>} : vector<64x64xf32>, vector<64x32xf32>, vector<64x32xf32> -> vector<64x32xf32>
    %23 = tpu.reciprocal %21 {approx = true} : vector<64x1xf32> -> vector<64x1xf32>
    %24 = arith.mulf %21, %23 : vector<64x1xf32>
    %cst_11 = arith.constant 2.000000e+00 : f32
    %25 = vector.broadcast %cst_11 : f32 to vector<64x1xf32>
    %26 = arith.subf %25, %24 : vector<64x1xf32>
    %27 = arith.mulf %23, %26 : vector<64x1xf32>
    %28 = vector.broadcast %27 : vector<64x1xf32> to vector<64x32xf32>
    %29 = arith.mulf %22, %28 : vector<64x32xf32>
    %30 = vector.broadcast %9 : f32 to vector<64x32xf32>
    %31 = arith.mulf %30, %29 : vector<64x32xf32>
    %32 = arith.addf %31, %13 : vector<64x32xf32>
    %c0_12 = arith.constant 0 : index
    %c0_13 = arith.constant 0 : index
    %33 = vector.load %arg5[%c0_12, %c0_13] : memref<128x32xf32, #tpu.memory_space<vmem>>, vector<64x32xf32>
    tpu.vector_store %arg5[%c0_12, %c0_13], %32 {strides = array<i32>} : memref<128x32xf32, #tpu.memory_space<vmem>>, vector<64x32xf32>,
    %34 = vector.extract_strided_slice %6 {offsets = [64, 0], sizes = [64, 4], strides = [1, 1]} : vector<128x4xf32> to vector<64x4xf32>
    %35 = vector.extract_strided_slice %7 {offsets = [64, 0], sizes = [64, 4], strides = [1, 1]} : vector<128x4xf32> to vector<64x4xf32>
    %36 = vector.extract_strided_slice %8 {offsets = [64, 0], sizes = [64, 32], strides = [1, 1]} : vector<128x32xf32> to vector<64x32xf32>
    %37 = vector.extract_strided_slice %0 {offsets = [64, 0], sizes = [64, 32], strides = [1, 1]} : vector<128x32xf32> to vector<64x32xf32>
    %cst_14 = arith.constant dense<0.000000e+00> : vector<64x64xf32>
    %38 = tpu.matmul %34, %35, %cst_14 {dimension_numbers = #tpu.dot_dimension_numbers<[1], [1], [0], [0], [0, 0, 1, 0], [], []>} : vector<64x4xf32>, vector<64x4xf32>, vector<64x64xf32> -> vector<64x64xf32>
    %cst_15 = arith.constant dense<0xFF800000> : vector<64xf32>
    %39 = vector.multi_reduction <maximumf>, %38, %cst_15 [1] : vector<64x64xf32> to vector<64xf32>
    %40 = vector.shape_cast %39 : vector<64xf32> to vector<64x1xf32>
    %41 = vector.broadcast %40 : vector<64x1xf32> to vector<64x64xf32>
    %42 = arith.subf %38, %41 : vector<64x64xf32>
    %43 = math.exp %42 : vector<64x64xf32>
    %cst_16 = arith.constant dense<0.000000e+00> : vector<64xf32>
    %44 = vector.multi_reduction <add>, %43, %cst_16 [1] : vector<64x64xf32> to vector<64xf32>
    %45 = vector.shape_cast %44 : vector<64xf32> to vector<64x1xf32>
    %cst_17 = arith.constant dense<0.000000e+00> : vector<64x32xf32>
    %46 = tpu.matmul %43, %36, %cst_17 {dimension_numbers = #tpu.dot_dimension_numbers<[1], [0], [0], [1], [0, 0, 1, 1], [], []>} : vector<64x64xf32>, vector<64x32xf32>, vector<64x32xf32> -> vector<64x32xf32>
    %47 = tpu.reciprocal %45 {approx = true} : vector<64x1xf32> -> vector<64x1xf32>
    %48 = arith.mulf %45, %47 : vector<64x1xf32>
    %cst_18 = arith.constant 2.000000e+00 : f32
    %49 = vector.broadcast %cst_18 : f32 to vector<64x1xf32>
    %50 = arith.subf %49, %48 : vector<64x1xf32>
    %51 = arith.mulf %47, %50 : vector<64x1xf32>
    %52 = vector.broadcast %51 : vector<64x1xf32> to vector<64x32xf32>
    %53 = arith.mulf %46, %52 : vector<64x32xf32>
    %54 = vector.broadcast %9 : f32 to vector<64x32xf32>
    %55 = arith.mulf %54, %53 : vector<64x32xf32>
    %56 = arith.addf %55, %37 : vector<64x32xf32>
    %c64 = arith.constant 64 : index
    %c0_19 = arith.constant 0 : index
    %57 = vector.load %arg5[%c64, %c0_19] : memref<128x32xf32, #tpu.memory_space<vmem>>, vector<64x32xf32>
    tpu.vector_store %arg5[%c64, %c0_19], %56 {strides = array<i32>} : memref<128x32xf32, #tpu.memory_space<vmem>>, vector<64x32xf32>,
    return
  }
  func.func @transform_0(%arg0: i32) -> (i32, i32) {
    %c0_i32 = arith.constant 0 : i32
    %c0_i32_0 = arith.constant 0 : i32
    return %arg0, %c0_i32 : i32, i32
  }
  func.func @transform_1(%arg0: i32) -> (i32, i32) {
    %c0_i32 = arith.constant 0 : i32
    %c0_i32_0 = arith.constant 0 : i32
    %c0_i32_1 = arith.constant 0 : i32
    return %c0_i32, %c0_i32_0 : i32, i32
  }
  func.func @transform_2(%arg0: i32) -> (i32, i32) {
    %c0_i32 = arith.constant 0 : i32
    %c0_i32_0 = arith.constant 0 : i32
    %c0_i32_1 = arith.constant 0 : i32
    return %c0_i32, %c0_i32_0 : i32, i32
  }
  func.func @transform_3(%arg0: i32) -> (i32, i32) {
    %c0_i32 = arith.constant 0 : i32
    %c0_i32_0 = arith.constant 0 : i32
    %c0_i32_1 = arith.constant 0 : i32
    return %c0_i32, %c0_i32_0 : i32, i32
  }
  func.func @transform_4(%arg0: i32) -> (i32, i32) {
    %c0_i32 = arith.constant 0 : i32
    %c0_i32_0 = arith.constant 0 : i32
    return %arg0, %c0_i32 : i32, i32
  }
}

</mosaic_0001>

<bundles_post_ra>
// kernel: tpu_custom_call.1
= control target key start
LH: loop header
LB: loop body
LE: loop exit
PB: predicated region body
PF: predicated region fallthrough
CT: control target
= control target key end

     0   :  { %s1975_s17 = smov 0   ;;  %s2374_s0 = inlined_call_operand.vmem [shape: f32[256,32], index: 0, kind: input, shape index: {}]   ;;  %s2375_s1 = inlined_call_operand.vmem [shape: f32[32,40], index: 1, kind: input, shape index: {}]   ;;  %s2376_s2 = inlined_call_operand.vmem [shape: f32[1,40], index: 2, kind: input, shape index: {}]   ;;  %s2377_s3 = inlined_call_operand.<no memory space> [shape: f32[1,1], index: 3, kind: input, shape index: {}]   ;;  %s2378_s4 = inlined_call_operand.vmem [shape: f32[256,32], index: 4, kind: output, shape index: {}]  }
   0x1   :  { %9 = sst [smem:[#allocation2]] %s2377_s3 }
   0x2 LB: > { %s1383_s18 = sadd.s32 4294967295, %s1943_s17   ;;  %p1387_p0 = scmp.ge.s32.totalorder %s1943_s17, 1  ;;  %s1943_s17 = sphi %s1975_s17, %s15_s17  }
   0x3   : > { %p164_p1 = scmp.lt.s32.totalorder %s1943_s17, 3 }
   0x5   : > { %p165_p2 = pnand %p1387_p0, %p164_p1 }
   0x6   : > { %v218_v0 = vld [vmem:[%s2375_s1] sm:$0xff] (!%p165_p2)  ;;  %v219_v1 = vld [vmem:[%s2375_s1 + $0x8] sm:$0xff] (!%p165_p2)  ;;  %v220_v2 = vld [vmem:[%s2375_s1 + $0x10] sm:$0xff] (!%p165_p2)  ;;  %s1388_s24 = sshll.u32 (!%p165_p2), %s1383_s18, 4  ;;  %vm229_vm0 = vcmask (!%p165_p2), 261120   ;;  %vm448_vm1 = vcmask (!%p165_p2), 31744  }
   0x7   : > { %168 = sbr.rel (%p165_p2) target bundleno = 1081 (0x439), region = 36  ;;  %v1687_v3 = vpack.c.bf16 (!%p165_p2), %v219_v1, %v218_v0  ;;  %v221_v4 = vld [vmem:[%s2375_s1 + $0x18] sm:$0xff] (!%p165_p2)  ;;  %p191_p3 = scmp.lt.s32.totalorder (!%p165_p2), %s1388_s24, 31  ;;  %v1392_v22 = vld [vmem:[%s2376_s2] ss:$0 sm:$0xff] (!%p165_p2)  ;;  %vm2134_vm2 = vmpackc.low (!%p165_p2), %vm448_vm1, %vm448_vm1  ;;  %vm586_vm3 = vcmask (!%p165_p2), 523264  }
   0x8   : > { %v1691_v5 = vpack.c.bf16 (!%p165_p2), %v221_v4, %v220_v2  ;;  %s1945_s7 = smov (!%p165_p2), 124   ;;  %s1946_s8 = smov (!%p165_p2), 120  }
   0x9   : > { %1688 = vmatprep.subr.bf16.mxu0 (!%p165_p2), %v1687_v3  ;;  %s423_s9 = sld [smem:[#allocation2]] (!%p165_p2) }
   0xa   : > { %1690 = vmatpush3.bf16.msra.mxu0 (!%p165_p2), %v1687_v3 }
   0xb   : > { %1692 = vmatprep.subr.bf16.mxu0 (!%p165_p2), %v1691_v5 }
   0xe   : > { %s2382_s24 = smov (!%p191_p3, %s1388_s24), 31  ;;  %1694 = vmatpush3.bf16.msra.mxu0 %v1691_v5 }
   0xf   : > { %s1389_s27 = sshll.u32 %s2382_s24, 3 }
  0x10   : > { %s2003_s30 = scalar_lea.vmem %s2374_s0, %s1389_s27  ;;  %s2306_s12 = scalar_lea.vmem %s2378_s4, %s1389_s27 }
  0x11   : > { %v2006_v6 = vld [vmem:[%s2003_s30] sm:$0xff]  ;;  %v2011_v7 = vld [vmem:[%s2003_s30 + $0x8] sm:$0xff]  ;;  %v2014_v8 = vld [vmem:[%s2003_s30 + $0x10] sm:$0xff] }
  0x12   : > { %1551 = vmatprep.mubr.msk.f32.mxu0 %vm229_vm0, %v2006_v6  ;;  %v2021_v9 = vld [vmem:[%s2003_s30 + $0x18] sm:$0xff]  ;;  %v2024_v10 = vld [vmem:[%s2003_s30 + $0x20] sm:$0xff]  ;;  %v2031_v11 = vld [vmem:[%s2003_s30 + $0x28] sm:$0xff] }
  0x13   : > { %1552 = vmatmul.mubr.msk.f32.vlgmr.msra.gmra.mrb[0].mxu0 %vm229_vm0, %v2011_v7  ;;  %v2034_v12 = vld [vmem:[%s2003_s30 + $0x30] sm:$0xff]  ;;  %v2041_v13 = vld [vmem:[%s2003_s30 + $0x38] sm:$0xff]  ;;  %v210_v14 = vld [vmem:[%s2003_s30 + $0x40] sm:$0xff] }
  0x14   : > { %1554 = vmatprep.mubr.msk.f32.mxu0 %vm229_vm0, %v2014_v8  ;;  %v211_v15 = vld [vmem:[%s2003_s30 + $0x48] sm:$0xff]  ;;  %v212_v16 = vld [vmem:[%s2003_s30 + $0x50] sm:$0xff]  ;;  %v213_v17 = vld [vmem:[%s2003_s30 + $0x58] sm:$0xff] }
  0x15   : > { %v214_v18 = vld [vmem:[%s2003_s30 + $0x60] sm:$0xff]  ;;  %v215_v19 = vld [vmem:[%s2003_s30 + $0x68] sm:$0xff]  ;;  %v216_v20 = vld [vmem:[%s2003_s30 + $0x70] sm:$0xff] }
  0x16   : > { %v217_v21 = vld [vmem:[%s2003_s30 + $0x78] sm:$0xff] }
  0x17   : > { %1555 = vmatmul.mubr.msk.f32.gmra.mrb[2].mxu0 %vm229_vm0, %v2021_v9 }
  0x18   : > { %1557 = vmatprep.mubr.msk.f32.mxu0 %vm229_vm0, %v2024_v10 }
  0x1b   : > { %1558 = vmatmul.mubr.msk.f32.gmra.mrb[4].mxu0 %vm229_vm0, %v2031_v11 }
  0x1c   : > { %1560 = vmatprep.mubr.msk.f32.mxu0 %vm229_vm0, %v2034_v12 }
  0x1f   : > { %1561 = vmatmul.mubr.msk.f32.gmra.mrb[6].mxu0 %vm229_vm0, %v2041_v13 }
  0x20   : > { %1563 = vmatprep.mubr.msk.f32.mxu0 %vm229_vm0, %v210_v14 }
  0x23   : > { %1564 = vmatmul.mubr.msk.f32.gmra.mrb[8].mxu0 %vm229_vm0, %v211_v15 }
  0x24   : > { %1566 = vmatprep.mubr.msk.f32.mxu0 %vm229_vm0, %v212_v16 }
  0x27   : > { %1567 = vmatmul.mubr.msk.f32.gmra.mrb[10].mxu0 %vm229_vm0, %v213_v17 }
  0x28   : > { %1569 = vmatprep.mubr.msk.f32.mxu0 %vm229_vm0, %v214_v18 }
  0x2b   : > { %1570 = vmatmul.mubr.msk.f32.gmra.mrb[12].mxu0 %vm229_vm0, %v215_v19 }
  0x2c   : > { %1572 = vmatprep.mubr.msk.f32.mxu0 %vm229_vm0, %v216_v20 }
  0x2f   : > { %1573 = vmatmul.mubr.msk.f32.gmra.mrb[14].mxu0 %vm229_vm0, %v217_v21 }
  0xe6   : > { %v1553_v23 = vpop.f32.mrb[0].mxu0 }
  0xe7   : > { %v2064_v24 = vadd.f32 %v1553_v23, %v1392_v22  ;;  %v344_v25 = vpop.f32.mrb[1].mxu0 }
  0xe8   : > { %v345_v26 = vadd.f32 %v1392_v22, %v344_v25 }
  0xea   : > { %1591 = vmatprep.mubr.msk.f32.mxu1 %vm448_vm1, %v345_v26  ;;  %v1785_v27 = vpack.i.bf16 %v2064_v24, %v345_v26  ;;  %v1556_v28 = vpop.f32.mrb[2].mxu0 }
  0xeb   : > { %v2068_v29 = vadd.f32 %v1556_v28, %v1392_v22  ;;  %v354_v30 = vpop.f32.mrb[3].mxu0 }
  0xec   : > { %1786 = vrot.lane.b32.xlu0 %v1785_v27, %s1945_s7  ;;  %v2071_v31 = vadd.f32 %v1392_v22, %v354_v30 }
  0xee   : > { %v1790_v32 = vpack.i.bf16 %v2068_v29, %v2071_v31  ;;  %v1559_v33 = vpop.f32.mrb[4].mxu0 }
  0xef   : > { %v2075_v34 = vadd.f32 %v1559_v33, %v1392_v22  ;;  %v364_v35 = vpop.f32.mrb[5].mxu0 }
  0xf0   : > { %1791 = vrot.lane.b32.xlu0 %v1790_v32, %s1945_s7  ;;  %v2078_v36 = vadd.f32 %v1392_v22, %v364_v35 }
  0xf2   : > { %v1562_v37 = vpop.f32.mrb[6].mxu0  ;;  %v1795_v38 = vpack.i.bf16 %v2075_v34, %v2078_v36 }
  0xf3   : > { %v2082_v39 = vadd.f32 %v1562_v37, %v1392_v22  ;;  %v374_v40 = vpop.f32.mrb[7].mxu0 }
  0xf4   : > { %v2084_v41 = vadd.f32 %v1392_v22, %v374_v40  ;;  %1796 = vrot.lane.b32.xlu1 %v1795_v38, %s1945_s7 }
  0xf6   : > { %v1565_v42 = vpop.f32.mrb[8].mxu0  ;;  %v1800_v43 = vpack.i.bf16 %v2082_v39, %v2084_v41 }
  0xf7   : > { %v2089_v44 = vadd.f32 %v1565_v42, %v1392_v22  ;;  %v384_v45 = vpop.f32.mrb[9].mxu0 }
  0xf8   : > { %v2091_v46 = vadd.f32 %v1392_v22, %v384_v45  ;;  %1801 = vrot.lane.b32.xlu1 %v1800_v43, %s1945_s7 }
  0xfa   : > { %v1568_v47 = vpop.f32.mrb[10].mxu0  ;;  %v1805_v48 = vpack.i.bf16 %v2089_v44, %v2091_v46 }
  0xfb   : > { %v2096_v49 = vadd.f32 %v1568_v47, %v1392_v22  ;;  %v394_v50 = vpop.f32.mrb[11].mxu0 }
  0xfc   : > { %v2098_v51 = vadd.f32 %v1392_v22, %v394_v50  ;;  %1806 = vrot.lane.b32.xlu0 %v1805_v48, %s1945_s7 }
  0xfe   : > { %v1571_v52 = vpop.f32.mrb[12].mxu0  ;;  %v2103_v53 = vpack.i.bf16 %v2096_v49, %v2098_v51 }
  0xff   : > { %v2105_v54 = vadd.f32 %v1571_v52, %v1392_v22  ;;  %v404_v55 = vpop.f32.mrb[13].mxu0 }
 0x100   : > { %v2107_v56 = vadd.f32 %v1392_v22, %v404_v55  ;;  %1811 = vrot.lane.b32.xlu1 %v2103_v53, %s1945_s7 }
 0x102   : > { %v1574_v57 = vpop.f32.mrb[14].mxu0  ;;  %v2113_v58 = vpack.i.bf16 %v2105_v54, %v2107_v56 }
 0x103   : > { %v2115_v59 = vadd.f32 %v1574_v57, %v1392_v22  ;;  %v414_v60 = vpop.f32.mrb[15].mxu0 }
 0x104   : > { %v2117_v61 = vadd.f32 %v1392_v22, %v414_v60  ;;  %1816 = vrot.lane.b32.xlu0 %v2113_v58, %s1945_s7 }
 0x106   : > { %v2123_v62 = vpack.i.bf16 %v2115_v59, %v2117_v61 }
 0x108   : > { %1821 = vrot.lane.b32.xlu1 %v2123_v62, %s1945_s7  ;;  %1826 = vrot.lane.b32.xlu0 %v1785_v27, %s1946_s8 }
 0x10c   : > { %1831 = vrot.lane.b32.xlu1 %v1790_v32, %s1946_s8  ;;  %1836 = vrot.lane.b32.xlu0 %v1795_v38, %s1946_s8 }
 0x110   : > { %1841 = vrot.lane.b32.xlu1 %v1800_v43, %s1946_s8  ;;  %1846 = vrot.lane.b32.xlu0 %v1805_v48, %s1946_s8 }
 0x15e   : > { %v1787_v63 = vpop.permute.xlu0 %1786 }
 0x15f   : > { %v1789_v0 = vunpack.i.h.bf16 %v1787_v63  ;;  %v1788_v1 = vunpack.i.l.bf16 %v1787_v63 }
 0x161   : > { %v1695_v3 = vpack.c.bf16 %v1789_v0, %v1788_v1 }
 0x162   : > { %v1792_v4 = vpop.permute.xlu0 %1791 }
 0x163   : > { %1697 = vmatprep.subr.msk.bf16.mxu1 %vm2134_vm2, %v1695_v3  ;;  %v1794_v5 = vunpack.i.h.bf16 %v1792_v4  ;;  %v1793_v14 = vunpack.i.l.bf16 %v1792_v4 }
 0x164   : > { %1700 = vmatpush3.bf16.xpose.msk.msra.mxu1 %vm2134_vm2, %v1695_v3 }
 0x165   : > { %v1701_v15 = vpack.c.bf16 %v1794_v5, %v1793_v14 }
 0x166   : > { %v1797_v16 = vpop.permute.xlu1 %1796 }
 0x167   : > { %1703 = vmatprep.subr.msk.bf16.mxu1 %vm2134_vm2, %v1701_v15  ;;  %v1799_v17 = vunpack.i.h.bf16 %v1797_v16  ;;  %v1798_v18 = vunpack.i.l.bf16 %v1797_v16 }
 0x169   : > { %v1707_v19 = vpack.c.bf16 %v1799_v17, %v1798_v18 }
 0x16a   : > { %v1802_v20 = vpop.permute.xlu1 %1801 }
 0x16b   : > { %v1804_v21 = vunpack.i.h.bf16 %v1802_v20  ;;  %v1803_v22 = vunpack.i.l.bf16 %v1802_v20 }
 0x16c   : > { %1706 = vmatpush3.bf16.xpose.msk.msra.mxu1 %vm2134_vm2, %v1701_v15 }
 0x16d   : > { %1709 = vmatprep.subr.msk.bf16.mxu1 %vm2134_vm2, %v1707_v19  ;;  %v1713_v25 = vpack.c.bf16 %v1804_v21, %v1803_v22 }
 0x16e   : > { %v1807_v23 = vpop.permute.xlu0 %1806 }
 0x16f   : > { %v1809_v27 = vunpack.i.h.bf16 %v1807_v23  ;;  %v1808_v28 = vunpack.i.l.bf16 %v1807_v23 }
 0x171   : > { %v1735_v32 = vpack.c.bf16 %v1809_v27, %v1808_v28 }
 0x172   : > { %v1812_v26 = vpop.permute.xlu1 %1811 }
 0x173   : > { %v1814_v42 = vunpack.i.h.bf16 %v1812_v26  ;;  %v1813_v43 = vunpack.i.l.bf16 %v1812_v26 }
 0x174   : > { %1712 = vmatpush3.bf16.xpose.msk.msra.mxu1 %vm2134_vm2, %v1707_v19 }
 0x175   : > { %1715 = vmatprep.subr.msk.bf16.mxu1 %vm2134_vm2, %v1713_v25  ;;  %v1741_v60 = vpack.c.bf16 %v1814_v42, %v1813_v43 }
 0x176   : > { %v1817_v30 = vpop.permute.xlu0 %1816 }
 0x177   : > { %v1819_v5 = vunpack.i.h.bf16 %v1817_v30  ;;  %v1818_v14 = vunpack.i.l.bf16 %v1817_v30 }
 0x17a   : > { %v1822_v33 = vpop.permute.xlu1 %1821  ;;  %v1827_v35 = vpop.permute.xlu0 %1826 }
 0x17b   : > { %v1829_v37 = vunpack.i.h.bf16 %v1827_v35  ;;  %v1828_v38 = vunpack.i.l.bf16 %v1827_v35  ;;  %v1823_v18 = vunpack.i.l.bf16 %v1822_v33 }
 0x17c   : > { %1718 = vmatpush3.bf16.xpose.msk.msra.mxu1 %vm2134_vm2, %v1713_v25 }
 0x17d   : > { %v1719_v40 = vpack.c.bf16 %v1829_v37, %v1828_v38  ;;  %1737 = vmatprep.subr.msk.bf16.mxu1 %vm2134_vm2, %v1735_v32 }
 0x17e   : > { %v1832_v45 = vpop.permute.xlu1 %1831  ;;  %v1837_v47 = vpop.permute.xlu0 %1836 }
 0x17f   : > { %v1834_v48 = vunpack.i.h.bf16 %v1832_v45  ;;  %v1833_v50 = vunpack.i.l.bf16 %v1832_v45  ;;  %v1839_v52 = vunpack.i.h.bf16 %v1837_v47  ;;  %v1838_v55 = vunpack.i.l.bf16 %v1837_v47  ;;  %1720 = vmatprep.subr.bf16.mxu0 %v1719_v40 }
 0x180   : > { %1722 = vmatpush3.bf16.msra.mxu0 %v1719_v40 }
 0x181   : > { %v1723_v57 = vpack.c.bf16 %v1834_v48, %v1833_v50  ;;  %v1727_v0 = vpack.c.bf16 %v1839_v52, %v1838_v55 }
 0x182   : > { %v1842_v63 = vpop.permute.xlu1 %1841  ;;  %v1847_v4 = vpop.permute.xlu0 %1846 }
 0x183   : > { %v1844_v1 = vunpack.i.h.bf16 %v1842_v63  ;;  %v1843_v3 = vunpack.i.l.bf16 %v1842_v63  ;;  %1592 = vmatmul.mubr.msk.f32.vlgmr.msra.gmra.mrb[0].mxu1 %vm448_vm1, %v2064_v24  ;;  %1724 = vmatprep.subr.bf16.mxu0 %v1723_v57  ;;  %v1849_v16 = vunpack.i.h.bf16 %v1847_v4  ;;  %v1848_v17 = vunpack.i.l.bf16 %v1847_v4 }
 0x184   : > { %1594 = vmatprep.mubr.msk.f32.mxu1 %vm448_vm1, %v2071_v31  ;;  %1726 = vmatpush3.bf16.msra.mxu0 %v1723_v57  ;;  %v1747_v24 = vpack.c.bf16 %v1819_v5, %v1818_v14 }
 0x185   : > { %1740 = vmatpush3.bf16.xpose.msk.msra.mxu1 %vm2134_vm2, %v1735_v32  ;;  %1728 = vmatprep.subr.bf16.mxu0 %v1727_v0  ;;  %v1731_v15 = vpack.c.bf16 %v1844_v1, %v1843_v3  ;;  %v2168_v31 = vpack.c.bf16 %v1849_v16, %v1848_v17 }
 0x186   : > { %1743 = vmatprep.subr.msk.bf16.mxu1 %vm2134_vm2, %v1741_v60 }
 0x187   : > { %1595 = vmatmul.mubr.msk.f32.gmra.mrb[2].mxu1 %vm448_vm1, %v2068_v29  ;;  %v1824_v29 = vunpack.i.h.bf16 %v1822_v33 }
 0x188   : > { %1597 = vmatprep.mubr.msk.f32.mxu1 %vm448_vm1, %v2078_v36  ;;  %1730 = vmatpush3.bf16.msra.mxu0 %v1727_v0 }
 0x189   : > { %1732 = vmatprep.subr.bf16.mxu0 %v1731_v15 }
 0x18b   : > { %1598 = vmatmul.mubr.msk.f32.gmra.mrb[4].mxu1 %vm448_vm1, %v2075_v34  ;;  %v1753_v34 = vpack.c.bf16 %v1824_v29, %v1823_v18 }
 0x18c   : > { %1600 = vmatprep.mubr.msk.f32.mxu1 %vm448_vm1, %v2084_v41  ;;  %1734 = vmatpush3.bf16.msra.mxu0 %v1731_v15 }
 0x18d   : > { %1746 = vmatpush3.bf16.xpose.msk.msra.mxu1 %vm2134_vm2, %v1741_v60  ;;  %1760 = vmatprep.subr.bf16.mxu0 %v2168_v31 }
 0x18e   : > { %1749 = vmatprep.subr.msk.bf16.mxu1 %vm2134_vm2, %v1747_v24 }
 0x18f   : > { %1601 = vmatmul.mubr.msk.f32.gmra.mrb[6].mxu1 %vm448_vm1, %v2082_v39 }
 0x190   : > { %1647 = vmatprep.mubr.msk.f32.mxu1 %vm448_vm1, %v2091_v46 }
 0x195   : > { %1752 = vmatpush3.bf16.xpose.msk.msra.mxu1 %vm2134_vm2, %v1747_v24 }
 0x196   : > { %1755 = vmatprep.subr.msk.bf16.mxu1 %vm2134_vm2, %v1753_v34 }
 0x19d   : > { %1758 = vmatpush3.bf16.xpose.msk.msra.mxu1 %vm2134_vm2, %v1753_v34 }
 0x1a4   : > { %1648 = vmatmul.mubr.msk.f32.vlgmr.msra.gmra.mrb[8].mxu1 %vm448_vm1, %v2089_v44 }
 0x1a5   : > { %1650 = vmatprep.mubr.msk.f32.mxu1 %vm448_vm1, %v2098_v51 }
 0x1a8   : > { %1651 = vmatmul.mubr.msk.f32.gmra.mrb[10].mxu1 %vm448_vm1, %v2096_v49 }
 0x1a9   : > { %1653 = vmatprep.mubr.msk.f32.mxu1 %vm448_vm1, %v2107_v56 }
 0x1ac   : > { %1654 = vmatmul.mubr.msk.f32.gmra.mrb[12].mxu1 %vm448_vm1, %v2105_v54 }
 0x1ad   : > { %1656 = vmatprep.mubr.msk.f32.mxu1 %vm448_vm1, %v2117_v61 }
 0x1b0   : > { %1657 = vmatmul.mubr.msk.f32.gmra.mrb[14].mxu1 %vm448_vm1, %v2115_v59 }
 0x256   : > { %v1593_v36 = vpop.f32.mrb[0].mxu1 }
 0x257   : > { %v547_v39 = vpop.f32.mrb[1].mxu1  ;;  %v590_v41 = vsel %vm586_vm3, %v1593_v36, -inf }
 0x258   : > { %591 = vmax.xlane.f32.xlu1 %v590_v41  ;;  %v587_v44 = vsel %vm586_vm3, %v547_v39, -inf }
 0x259   : > { %588 = vmax.xlane.f32.xlu0 %v587_v44 }
 0x25a   : > { %v1596_v46 = vpop.f32.mrb[2].mxu1 }
 0x25b   : > { %v557_v49 = vpop.f32.mrb[3].mxu1  ;;  %v596_v51 = vsel %vm586_vm3, %v1596_v46, -inf }
 0x25c   : > { %v593_v61 = vsel %vm586_vm3, %v557_v49, -inf }
 0x25d   : > { %597 = vmax.xlane.f32.xlu0 %v596_v51 }
 0x25e   : > { %v2206_v54 = vpop.f32.mrb[4].mxu1 }
 0x25f   : > { %v567_v56 = vpop.f32.mrb[5].mxu1  ;;  %v602_v21 = vsel %vm586_vm3, %v2206_v54, -inf }
 0x260   : > { %v599_v59 = vsel %vm586_vm3, %v567_v56, -inf }
 0x261   : > { %594 = vmax.xlane.f32.xlu0 %v593_v61  ;;  %600 = vmax.xlane.f32.xlu1 %v599_v59 }
 0x262   : > { %v1602_v2 = vpop.f32.mrb[6].mxu1 }
 0x263   : > { %v2210_v19 = vpop.f32.mrb[7].mxu1  ;;  %v608_v20 = vsel %vm586_vm3, %v1602_v2, -inf }
 0x264   : > { %v605_v22 = vsel %vm586_vm3, %v2210_v19, -inf }
 0x265   : > { %603 = vmax.xlane.f32.xlu0 %v602_v21  ;;  %609 = vmax.xlane.f32.xlu1 %v608_v20 }
 0x269   : > { %606 = vmax.xlane.f32.xlu1 %v605_v22 }
 0x277   : > { %v2217_v23 = vpop.f32.mrb[8].mxu1 }
 0x278   : > { %v2219_v25 = vpop.f32.mrb[9].mxu1  ;;  %v1041_v26 = vsel %vm586_vm3, %v2217_v23, -inf }
 0x279   : > { %1042 = vmax.xlane.f32.xlu1 %v1041_v26  ;;  %v1038_v27 = vsel %vm586_vm3, %v2219_v25, -inf }
 0x27a   : > { %1039 = vmax.xlane.f32.xlu0 %v1038_v27 }
 0x27b   : > { %v2225_v28 = vpop.f32.mrb[10].mxu1 }
 0x27c   : > { %v2227_v30 = vpop.f32.mrb[11].mxu1  ;;  %v1047_v32 = vsel %vm586_vm3, %v2225_v28, -inf }
 0x27d   : > { %1048 = vmax.xlane.f32.xlu1 %v1047_v32  ;;  %v1044_v37 = vsel %vm586_vm3, %v2227_v30, -inf }
 0x27f   : > { %v2231_v33 = vpop.f32.mrb[12].mxu1 }
 0x280   : > { %v2233_v35 = vpop.f32.mrb[13].mxu1  ;;  %v1053_v43 = vsel %vm586_vm3, %v2231_v33, -inf }
 0x281   : > { %1045 = vmax.xlane.f32.xlu1 %v1044_v37  ;;  %v1050_v38 = vsel %vm586_vm3, %v2233_v35, -inf }
 0x282   : > { %1051 = vmax.xlane.f32.xlu0 %v1050_v38 }
 0x283   : > { %v2239_v40 = vpop.f32.mrb[14].mxu1 }
 0x284   : > { %v2241_v42 = vpop.f32.mrb[15].mxu1  ;;  %v1059_v45 = vsel %vm586_vm3, %v2239_v40, -inf }
 0x285   : > { %1054 = vmax.xlane.f32.xlu1 %v1053_v43  ;;  %v1056_v47 = vsel %vm586_vm3, %v2241_v42, -inf }
 0x289   : > { %1060 = vmax.xlane.f32.xlu1 %v1059_v45 }
 0x298   : > { %1856 = vrot.lane.b32.xlu0 %v2113_v58, %s1946_s8 }
 0x29a   : > { %1851 = vrot.lane.b32.xlu1 %v2103_v53, %s1946_s8 }
 0x2b7   : > { %1057 = vmax.xlane.f32.xlu0 %v1056_v47 }
 0x2cd   : > { %1861 = vrot.lane.b32.xlu0 %v2123_v62, %s1946_s8 }
 0x2e5   : > { %v592_v48 = vpop.xlane.xlu1 %591 }
 0x2e6   : > { %v612_v50 = vsub.f32 %v1593_v36, %v592_v48  ;;  %v589_v52 = vpop.xlane.xlu0 %588 }
 0x2e7   : > { %v611_v55 = vsub.f32 %v547_v39, %v589_v52 }
 0x2e8   : > { %v621_v57 = vmul.f32 1.442695, %v612_v50 }
 0x2e9   : > { %v619_v60 = vmul.f32 1.442695, %v611_v55 }
 0x2ea   : > { %1865 = vpow2.f32 %v621_v57  ;;  %v598_v63 = vpop.xlane.xlu0 %597 }
 0x2eb   : > { %1867 = vpow2.f32 %v619_v60  ;;  %v614_v58 = vsub.f32 %v1596_v46, %v598_v63 }
 0x2ed   : > { %v625_v0 = vmul.f32 1.442695, %v614_v58 }
 0x2ee   : > { %v595_v1 = vpop.xlane.xlu0 %594  ;;  %v601_v53 = vpop.xlane.xlu1 %600 }
 0x2ef   : > { %1869 = vpow2.f32 %v625_v0  ;;  %v613_v3 = vsub.f32 %v557_v49, %v595_v1  ;;  %v615_v4 = vsub.f32 %v567_v56, %v601_v53 }
 0x2f1   : > { %v623_v5 = vmul.f32 1.442695, %v613_v3  ;;  %v627_v14 = vmul.f32 1.442695, %v615_v4 }
 0x2f2   : > { %v604_v15 = vpop.xlane.xlu0 %603  ;;  %v610_v62 = vpop.xlane.xlu1 %609 }
 0x2f3   : > { %1871 = vpow2.f32 %v623_v5  ;;  %v616_v16 = vsub.f32 %v2206_v54, %v604_v15  ;;  %v618_v17 = vsub.f32 %v1602_v2, %v610_v62 }
 0x2f4   : > { %v1866_v24 = vpop.eup %1865  ;;  %1873 = vpow2.f32 %v627_v14 }
 0x2f5   : > { %v1868_v29 = vpop.eup %1867  ;;  %v629_v18 = vmul.f32 1.442695, %v616_v16  ;;  %v633_v34 = vmul.f32 1.442695, %v618_v17  ;;  %v638_v36 = vsel %vm586_vm3, %v1866_v24, 0.0 }
 0x2f6   : > { %1619 = vmatprep.mubr.msk.f32.mxu0 %vm586_vm3, %v1868_v29  ;;  %639 = vadd.xlane.f32.xlu1 %v638_v36  ;;  %v607_v39 = vpop.xlane.xlu1 %606  ;;  %v635_v41 = vsel %vm586_vm3, %v1868_v29, 0.0 }
 0x2f7   : > { %1875 = vpow2.f32 %v629_v18  ;;  %v617_v44 = vsub.f32 %v2210_v19, %v607_v39  ;;  %1620 = vmatmul.mubr.msk.f32.vlgmr.msra.gmra.mrb[16].mxu0 %vm586_vm3, %v1866_v24  ;;  %636 = vadd.xlane.f32.xlu0 %v635_v41 }
 0x2f8   : > { %1762 = vmatpush3.bf16.msra.mxu0 %v2168_v31  ;;  %1877 = vpow2.f32 %v633_v34 }
 0x2f9   : > { %v1870_v46 = vpop.eup %1869  ;;  %v631_v49 = vmul.f32 1.442695, %v617_v44 }
 0x2fa   : > { %v644_v51 = vsel %vm586_vm3, %v1870_v46, 0.0 }
 0x2fb   : > { %1879 = vpow2.f32 %v631_v49  ;;  %645 = vadd.xlane.f32.xlu0 %v644_v51 }
 0x2fd   : > { %v1872_v54 = vpop.eup %1871 }
 0x2fe   : > { %v1874_v56 = vpop.eup %1873  ;;  %1622 = vmatprep.mubr.msk.f32.mxu0 %vm586_vm3, %v1872_v54  ;;  %v641_v61 = vsel %vm586_vm3, %v1872_v54, 0.0 }
 0x2ff   : > { %1623 = vmatmul.mubr.msk.f32.gmra.mrb[18].mxu0 %vm586_vm3, %v1870_v46  ;;  %642 = vadd.xlane.f32.xlu0 %v641_v61  ;;  %v647_v59 = vsel %vm586_vm3, %v1874_v56, 0.0 }
 0x300   : > { %648 = vadd.xlane.f32.xlu1 %v647_v59  ;;  %1625 = vmatprep.mubr.msk.f32.mxu0 %vm586_vm3, %v1874_v56 }
 0x301   : > { %v1876_v31 = vpop.eup %1875 }
 0x302   : > { %v650_v2 = vsel %vm586_vm3, %v1876_v31, 0.0  ;;  %v1878_v19 = vpop.eup %1877 }
 0x303   : > { %1626 = vmatmul.mubr.msk.f32.gmra.mrb[20].mxu0 %vm586_vm3, %v1876_v31  ;;  %651 = vadd.xlane.f32.xlu0 %v650_v2  ;;  %v656_v22 = vsel %vm586_vm3, %v1878_v19, 0.0 }
 0x305   : > { %v1880_v20 = vpop.eup %1879 }
 0x306   : > { %v1043_v21 = vpop.xlane.xlu1 %1042  ;;  %1628 = vmatprep.mubr.msk.f32.mxu0 %vm586_vm3, %v1880_v20  ;;  %v653_v26 = vsel %vm586_vm3, %v1880_v20, 0.0 }
 0x307   : > { %v1063_v27 = vsub.f32 %v2217_v23, %v1043_v21  ;;  %v1040_v32 = vpop.xlane.xlu0 %1039  ;;  %657 = vadd.xlane.f32.xlu0 %v656_v22  ;;  %1629 = vmatmul.mubr.msk.f32.gmra.mrb[22].mxu0 %vm586_vm3, %v1878_v19 }
 0x308   : > { %v1062_v37 = vsub.f32 %v2219_v25, %v1040_v32  ;;  %654 = vadd.xlane.f32.xlu1 %v653_v26 }
 0x309   : > { %v1072_v38 = vmul.f32 1.442695, %v1063_v27 }
 0x30a   : > { %v1070_v43 = vmul.f32 1.442695, %v1062_v37  ;;  %v1049_v45 = vpop.xlane.xlu1 %1048 }
 0x30b   : > { %1881 = vpow2.f32 %v1072_v38  ;;  %v1065_v47 = vsub.f32 %v2225_v28, %v1049_v45 }
 0x30c   : > { %1883 = vpow2.f32 %v1070_v43 }
 0x30d   : > { %v1076_v48 = vmul.f32 1.442695, %v1065_v47 }
 0x30e   : > { %v1046_v50 = vpop.xlane.xlu1 %1045 }
 0x30f   : > { %1885 = vpow2.f32 %v1076_v48  ;;  %v1064_v52 = vsub.f32 %v2227_v30, %v1046_v50  ;;  %v1052_v23 = vpop.xlane.xlu0 %1051 }
 0x310   : > { %v1066_v55 = vsub.f32 %v2233_v35, %v1052_v23 }
 0x311   : > { %v1074_v57 = vmul.f32 1.442695, %v1064_v52 }
 0x312   : > { %v1078_v60 = vmul.f32 1.442695, %v1066_v55  ;;  %v1055_v63 = vpop.xlane.xlu1 %1054 }
 0x313   : > { %1887 = vpow2.f32 %v1074_v57  ;;  %v1067_v25 = vsub.f32 %v2231_v33, %v1055_v63  ;;  %v1857_v3 = vpop.permute.xlu0 %1856 }
 0x314   : > { %1889 = vpow2.f32 %v1078_v60  ;;  %v1859_v33 = vunpack.i.h.bf16 %v1857_v3  ;;  %v1858_v62 = vunpack.i.l.bf16 %v1857_v3 }
 0x315   : > { %v1882_v58 = vpop.eup %1881  ;;  %v1080_v0 = vmul.f32 1.442695, %v1067_v25 }
 0x316   : > { %v1884_v1 = vpop.eup %1883  ;;  %v1061_v28 = vpop.xlane.xlu1 %1060  ;;  %v1089_v53 = vsel %vm586_vm3, %v1882_v58, 0.0  ;;  %v1767_v34 = vpack.c.bf16 %v1859_v33, %v1858_v62 }
 0x317   : > { %1891 = vpow2.f32 %v1080_v0  ;;  %v1069_v30 = vsub.f32 %v2239_v40, %v1061_v28  ;;  %1675 = vmatprep.mubr.msk.f32.mxu0 %vm586_vm3, %v1884_v1  ;;  %1090 = vadd.xlane.f32.xlu0 %v1089_v53  ;;  %v1086_v35 = vsel %vm586_vm3, %v1884_v1, 0.0 }
 0x318   : > { %1087 = vadd.xlane.f32.xlu1 %v1086_v35 }
 0x319   : > { %v1886_v4 = vpop.eup %1885  ;;  %v1084_v5 = vmul.f32 1.442695, %v1069_v30 }
 0x31a   : > { %v1852_v14 = vpop.permute.xlu1 %1851  ;;  %v1095_v15 = vsel %vm586_vm3, %v1886_v4, 0.0 }
 0x31b   : > { %1893 = vpow2.f32 %v1084_v5  ;;  %v1854_v16 = vunpack.i.h.bf16 %v1852_v14  ;;  %v1853_v17 = vunpack.i.l.bf16 %v1852_v14  ;;  %1096 = vadd.xlane.f32.xlu0 %v1095_v15 }
 0x31d   : > { %v1888_v24 = vpop.eup %1887  ;;  %v1763_v29 = vpack.c.bf16 %v1854_v16, %v1853_v17 }
 0x31e   : > { %v1092_v40 = vsel %vm586_vm3, %v1888_v24, 0.0  ;;  %v1890_v18 = vpop.eup %1889 }
 0x31f   : > { %1093 = vadd.xlane.f32.xlu1 %v1092_v40  ;;  %1764 = vmatprep.subr.bf16.mxu0 %v1763_v29  ;;  %v1098_v39 = vsel %vm586_vm3, %v1890_v18, 0.0 }
 0x320   : > { %1766 = vmatpush3.bf16.msra.mxu0 %v1763_v29 }
 0x321   : > { %v1892_v36 = vpop.eup %1891  ;;  %1768 = vmatprep.subr.bf16.mxu0 %v1767_v34 }
 0x322   : > { %v1101_v41 = vsel %vm586_vm3, %v1892_v36, 0.0 }
 0x323   : > { %1099 = vadd.xlane.f32.xlu1 %v1098_v39  ;;  %1102 = vadd.xlane.f32.xlu0 %v1101_v41 }
 0x324   : > { %1770 = vmatpush3.bf16.msra.mxu0 %v1767_v34 }
 0x325   : > { %v1894_v44 = vpop.eup %1893 }
 0x326   : > { %v1107_v46 = vsel %vm586_vm3, %v1894_v44, 0.0 }
 0x327   : > { %1108 = vadd.xlane.f32.xlu0 %v1107_v46 }
 0x344   : > { %v1058_v49 = vpop.xlane.xlu0 %1057 }
 0x345   : > { %v1068_v51 = vsub.f32 %v2241_v42, %v1058_v49 }
 0x347   : > { %v1082_v54 = vmul.f32 1.442695, %v1068_v51 }
 0x348   : > { %v1862_v56 = vpop.permute.xlu0 %1861 }
 0x349   : > { %1895 = vpow2.f32 %v1082_v54  ;;  %v1864_v61 = vunpack.i.h.bf16 %v1862_v56  ;;  %v1863_v59 = vunpack.i.l.bf16 %v1862_v56 }
 0x34b   : > { %v1771_v31 = vpack.c.bf16 %v1864_v61, %v1863_v59 }
 0x34d   : > { %1772 = vmatprep.subr.bf16.mxu0 %v1771_v31 }
 0x34e   : > { %1774 = vmatpush3.bf16.msra.mxu0 %v1771_v31 }
 0x351   : > { %1676 = vmatmul.mubr.msk.f32.vlgmr.msra.gmra.mrb[24].mxu0 %vm586_vm3, %v1882_v58  ;;  %v2298_v58 = vstv %s423_s9 }
 0x352   : > { %1678 = vmatprep.mubr.msk.f32.mxu0 %vm586_vm3, %v1888_v24 }
 0x353   : > { %v1896_v2 = vpop.eup %1895 }
 0x354   : > { %v1104_v19 = vsel %vm586_vm3, %v1896_v2, 0.0 }
 0x355   : > { %1105 = vadd.xlane.f32.xlu1 %v1104_v19  ;;  %1679 = vmatmul.mubr.msk.f32.gmra.mrb[26].mxu0 %vm586_vm3, %v1886_v4 }
 0x356   : > { %1681 = vmatprep.mubr.msk.f32.mxu0 %vm586_vm3, %v1890_v18 }
 0x359   : > { %1682 = vmatmul.mubr.msk.f32.gmra.mrb[28].mxu0 %vm586_vm3, %v1892_v36 }
 0x35a   : > { %1684 = vmatprep.mubr.msk.f32.mxu0 %vm586_vm3, %v1896_v2 }
 0x35d   : > { %1685 = vmatmul.mubr.msk.f32.gmra.mrb[30].mxu0 %vm586_vm3, %v1894_v44 }
 0x383   : > { %v640_v21 = vpop.xlane.xlu1 %639 }
 0x384   : > { %v637_v42 = vpop.xlane.xlu0 %636  ;;  %1897 = vrcp.f32 %v640_v21 }
 0x385   : > { %1899 = vrcp.f32 %v637_v42 }
 0x388   : > { %v646_v20 = vpop.xlane.xlu0 %645 }
 0x389   : > { %1901 = vrcp.f32 %v646_v20 }
 0x38c   : > { %v643_v22 = vpop.xlane.xlu0 %642 }
 0x38d   : > { %1903 = vrcp.f32 %v643_v22  ;;  %v649_v32 = vpop.xlane.xlu1 %648 }
 0x38e   : > { %v1898_v27 = vpop.eup %1897 }
 0x38f   : > { %v1900_v37 = vpop.eup %1899  ;;  %v821_v38 = vmul.f32 %v1898_v27, %v640_v21 }
 0x390   : > { %v652_v26 = vpop.xlane.xlu0 %651  ;;  %v820_v45 = vmul.f32 %v1900_v37, %v637_v42 }
 0x391   : > { %1905 = vrcp.f32 %v652_v26  ;;  %v829_v48 = vsub.f32 2.0, %v821_v38 }
 0x392   : > { %1907 = vrcp.f32 %v649_v32  ;;  %v828_v52 = vsub.f32 2.0, %v820_v45 }
 0x393   : > { %v1902_v50 = vpop.eup %1901  ;;  %v837_v57 = vmul.f32 %v1898_v27, %v829_v48 }
 0x394   : > { %v658_v43 = vpop.xlane.xlu0 %657  ;;  %v823_v55 = vmul.f32 %v1902_v50, %v646_v20  ;;  %v836_v0 = vmul.f32 %v1900_v37, %v828_v52 }
 0x395   : > { %v655_v47 = vpop.xlane.xlu1 %654  ;;  %1909 = vrcp.f32 %v658_v43 }
 0x396   : > { %1911 = vrcp.f32 %v655_v47  ;;  %v831_v30 = vsub.f32 2.0, %v823_v55 }
 0x397   : > { %v1904_v23 = vpop.eup %1903 }
 0x398   : > { %v822_v63 = vmul.f32 %v1904_v23, %v643_v22  ;;  %v839_v40 = vmul.f32 %v1902_v50, %v831_v30 }
 0x39a   : > { %v830_v33 = vsub.f32 2.0, %v822_v63 }
 0x39b   : > { %v1906_v60 = vpop.eup %1905 }
 0x39c   : > { %v1908_v1 = vpop.eup %1907  ;;  %v825_v35 = vmul.f32 %v1906_v60, %v652_v26  ;;  %v838_v39 = vmul.f32 %v1904_v23, %v830_v33 }
 0x39d   : > { %v824_v14 = vmul.f32 %v1908_v1, %v649_v32 }
 0x39e   : > { %v833_v24 = vsub.f32 2.0, %v825_v35 }
 0x39f   : > { %v1910_v5 = vpop.eup %1909  ;;  %v832_v18 = vsub.f32 2.0, %v824_v14 }
 0x3a0   : > { %v1912_v62 = vpop.eup %1911  ;;  %v827_v29 = vmul.f32 %v1910_v5, %v658_v43 }
 0x3a1   : > { %v826_v34 = vmul.f32 %v1912_v62, %v655_v47  ;;  %v840_v61 = vmul.f32 %v1908_v1, %v832_v18 }
 0x3a2   : > { %v835_v49 = vsub.f32 2.0, %v827_v29 }
 0x3a3   : > { %v834_v51 = vsub.f32 2.0, %v826_v34 }
 0x3a4   : > { %v843_v21 = vmul.f32 %v1910_v5, %v835_v49 }
 0x3a5   : > { %v1088_v50 = vpop.xlane.xlu1 %1087 }
 0x3ac   : > { %v1094_v52 = vpop.xlane.xlu1 %1093 }
 0x3b0   : > { %v1100_v55 = vpop.xlane.xlu1 %1099 }
 0x3ca   : > { %v1621_v25 = vpop.f32.mrb[16].mxu0 }
 0x3cb   : > { %v845_v28 = vmul.f32 %v1621_v25, %v837_v57  ;;  %v773_v53 = vpop.f32.mrb[17].mxu0 }
 0x3cc   : > { %v844_v3 = vmul.f32 %v836_v0, %v773_v53 }
 0x3cd   : > { %v854_v4 = vmul.f32 %v2298_v58, %v845_v28 }
 0x3ce   : > { %v853_v15 = vmul.f32 %v2298_v58, %v844_v3 }
 0x3cf   : > { %v862_v16 = vadd.f32 %v854_v4, %v2011_v7 }
 0x3d0   : > { %v861_v17 = vadd.f32 %v853_v15, %v2006_v6  ;;  %v841_v6 = vmul.f32 %v1906_v60, %v833_v24 }
 0x3d1   : > { %870 = vst.msk [vmem:[%s2306_s12 + $0x8] sm:$0xff] %vm229_vm0, %v862_v16 }
 0x3d2   : > { %869 = vst.msk [vmem:[%s2306_s12] sm:$0xff] %vm229_vm0, %v861_v17  ;;  %v1624_v36 = vpop.f32.mrb[18].mxu0 }
 0x3d3   : > { %v847_v41 = vmul.f32 %v1624_v36, %v839_v40  ;;  %v783_v44 = vpop.f32.mrb[19].mxu0 }
 0x3d4   : > { %v846_v46 = vmul.f32 %v838_v39, %v783_v44 }
 0x3d5   : > { %v856_v7 = vmul.f32 %v2298_v58, %v847_v41 }
 0x3d6   : > { %v855_v54 = vmul.f32 %v2298_v58, %v846_v46  ;;  %v1627_v56 = vpop.f32.mrb[20].mxu0 }
 0x3d7   : > { %v864_v59 = vadd.f32 %v856_v7, %v2021_v9  ;;  %v849_v31 = vmul.f32 %v1627_v56, %v841_v6  ;;  %v793_v2 = vpop.f32.mrb[21].mxu0  ;;  %v842_v9 = vmul.f32 %v1912_v62, %v834_v51 }
 0x3d8   : > { %v863_v19 = vadd.f32 %v855_v54, %v2014_v8  ;;  %v848_v42 = vmul.f32 %v840_v61, %v793_v2  ;;  %v1929_v54 = vld [vmem:[%s2003_s30 + $0x48] sm:$0xff] }
 0x3d9   : > { %872 = vst.msk [vmem:[%s2306_s12 + $0x18] sm:$0xff] %vm229_vm0, %v864_v59  ;;  %v858_v20 = vmul.f32 %v2298_v58, %v849_v31  ;;  %v1930_v31 = vld [vmem:[%s2003_s30 + $0x40] sm:$0xff] }
 0x3da   : > { %871 = vst.msk [vmem:[%s2306_s12 + $0x10] sm:$0xff] %vm229_vm0, %v863_v19  ;;  %v857_v22 = vmul.f32 %v2298_v58, %v848_v42  ;;  %v1630_v26 = vpop.f32.mrb[22].mxu0 }
 0x3db   : > { %v866_v27 = vadd.f32 %v858_v20, %v2031_v11  ;;  %v851_v32 = vmul.f32 %v1630_v26, %v843_v21  ;;  %v803_v37 = vpop.f32.mrb[23].mxu0  ;;  %v1091_v11 = vpop.xlane.xlu0 %1090 }
 0x3dc   : > { %v865_v8 = vadd.f32 %v857_v22, %v2024_v10  ;;  %v850_v38 = vmul.f32 %v842_v9, %v803_v37  ;;  %1913 = vrcp.f32 %v1091_v11 }
 0x3dd   : > { %874 = vst.msk [vmem:[%s2306_s12 + $0x28] sm:$0xff] %vm229_vm0, %v866_v27  ;;  %v860_v43 = vmul.f32 %v2298_v58, %v851_v32  ;;  %1915 = vrcp.f32 %v1088_v50  ;;  %v1931_v32 = vld [vmem:[%s2003_s30 + $0x58] sm:$0xff] }
 0x3de   : > { %873 = vst.msk [vmem:[%s2306_s12 + $0x20] sm:$0xff] %vm229_vm0, %v865_v8  ;;  %v859_v45 = vmul.f32 %v2298_v58, %v850_v38 }
 0x3df   : > { %v868_v47 = vadd.f32 %v860_v43, %v2041_v13  ;;  %v1097_v10 = vpop.xlane.xlu0 %1096  ;;  %v1932_v43 = vld [vmem:[%s2003_s30 + $0x50] sm:$0xff] }
 0x3e0   : > { %v867_v48 = vadd.f32 %v859_v45, %v2034_v12  ;;  %1917 = vrcp.f32 %v1097_v10 }
 0x3e1   : > { %876 = vst.msk [vmem:[%s2306_s12 + $0x38] sm:$0xff] %vm229_vm0, %v868_v47  ;;  %1919 = vrcp.f32 %v1094_v52 }
 0x3e2   : > { %875 = vst.msk [vmem:[%s2306_s12 + $0x30] sm:$0xff] %vm229_vm0, %v867_v48  ;;  %v1106_v60 = vpop.xlane.xlu1 %1105 }
 0x3e3   : > { %v1103_v23 = vpop.xlane.xlu0 %1102 }
 0x3e4   : > { %1921 = vrcp.f32 %v1103_v23 }
 0x3e5   : > { %1923 = vrcp.f32 %v1100_v55 }
 0x3e6   : > { %v1914_v13 = vpop.eup %1913 }
 0x3e7   : > { %v1109_v57 = vpop.xlane.xlu0 %1108  ;;  %v1916_v12 = vpop.eup %1915  ;;  %v1272_v63 = vmul.f32 %v1914_v13, %v1091_v11 }
 0x3e8   : > { %1925 = vrcp.f32 %v1109_v57  ;;  %v1271_v0 = vmul.f32 %v1916_v12, %v1088_v50 }
 0x3e9   : > { %1927 = vrcp.f32 %v1106_v60  ;;  %v1280_v28 = vsub.f32 2.0, %v1272_v63 }
 0x3ea   : > { %v1918_v25 = vpop.eup %1917  ;;  %v1279_v30 = vsub.f32 2.0, %v1271_v0 }
 0x3eb   : > { %v1920_v1 = vpop.eup %1919  ;;  %v1274_v53 = vmul.f32 %v1918_v25, %v1097_v10  ;;  %v1288_v14 = vmul.f32 %v1914_v13, %v1280_v28 }
 0x3ec   : > { %v1273_v35 = vmul.f32 %v1920_v1, %v1094_v52  ;;  %v1287_v24 = vmul.f32 %v1916_v12, %v1279_v30 }
 0x3ed   : > { %v1282_v5 = vsub.f32 2.0, %v1274_v53  ;;  %v1936_v53 = vld [vmem:[%s2003_s30 + $0x70] sm:$0xff] }
 0x3ee   : > { %v1922_v3 = vpop.eup %1921  ;;  %v1281_v62 = vsub.f32 2.0, %v1273_v35 }
 0x3ef   : > { %v1924_v4 = vpop.eup %1923  ;;  %v1276_v33 = vmul.f32 %v1922_v3, %v1103_v23  ;;  %v1290_v44 = vmul.f32 %v1918_v25, %v1282_v5  ;;  %v1933_v23 = vld [vmem:[%s2003_s30 + $0x68] sm:$0xff] }
 0x3f0   : > { %v1275_v16 = vmul.f32 %v1924_v4, %v1100_v55  ;;  %v1289_v51 = vmul.f32 %v1920_v1, %v1281_v62  ;;  %v1935_v1 = vld [vmem:[%s2003_s30 + $0x78] sm:$0xff] }
 0x3f1   : > { %v1284_v36 = vsub.f32 2.0, %v1276_v33 }
 0x3f2   : > { %v1926_v15 = vpop.eup %1925  ;;  %v1283_v46 = vsub.f32 2.0, %v1275_v16 }
 0x3f3   : > { %v1928_v29 = vpop.eup %1927  ;;  %v1278_v39 = vmul.f32 %v1926_v15, %v1109_v57  ;;  %v1292_v21 = vmul.f32 %v1922_v3, %v1284_v36 }
 0x3f4   : > { %v1277_v49 = vmul.f32 %v1928_v29, %v1106_v60  ;;  %v1291_v27 = vmul.f32 %v1924_v4, %v1283_v46  ;;  %v1934_v60 = vld [vmem:[%s2003_s30 + $0x60] sm:$0xff] }
 0x3f5   : > { %v1286_v42 = vsub.f32 2.0, %v1278_v39 }
 0x3f6   : > { %v1285_v22 = vsub.f32 2.0, %v1277_v49 }
 0x3f7   : > { %v1294_v11 = vmul.f32 %v1926_v15, %v1286_v42 }
 0x3f8   : > { %v1293_v52 = vmul.f32 %v1928_v29, %v1285_v22 }
 0x424   : > { %v1677_v17 = vpop.f32.mrb[24].mxu0 }
 0x425   : > { %v1296_v40 = vmul.f32 %v1677_v17, %v1288_v14  ;;  %v1224_v18 = vpop.f32.mrb[25].mxu0 }
 0x426   : > { %v1295_v34 = vmul.f32 %v1287_v24, %v1224_v18 }
 0x427   : > { %v1304_v41 = vmul.f32 %v1296_v40, %v2298_v58 }
 0x428   : > { %v1303_v7 = vmul.f32 %v1295_v34, %v2298_v58  ;;  %v1680_v6 = vpop.f32.mrb[26].mxu0 }
 0x429   : > { %v1312_v56 = vadd.f32 %v1929_v54, %v1304_v41  ;;  %v1298_v61 = vmul.f32 %v1680_v6, %v1290_v44  ;;  %v1234_v59 = vpop.f32.mrb[27].mxu0 }
 0x42a   : > { %v1311_v2 = vadd.f32 %v1930_v31, %v1303_v7  ;;  %v1297_v19 = vmul.f32 %v1289_v51, %v1234_v59 }
 0x42b   : > { %1320 = vst.msk [vmem:[%s2306_s12 + $0x48] sm:$0xff] %vm229_vm0, %v1312_v56  ;;  %v1306_v20 = vmul.f32 %v1298_v61, %v2298_v58 }
 0x42c   : > { %1319 = vst.msk [vmem:[%s2306_s12 + $0x40] sm:$0xff] %vm229_vm0, %v1311_v2  ;;  %v1305_v26 = vmul.f32 %v1297_v19, %v2298_v58  ;;  %v1683_v9 = vpop.f32.mrb[28].mxu0 }
 0x42d   : > { %v1314_v37 = vadd.f32 %v1931_v32, %v1306_v20  ;;  %v1300_v8 = vmul.f32 %v1683_v9, %v1292_v21  ;;  %v1244_v38 = vpop.f32.mrb[29].mxu0 }
 0x42e   : > { %v1313_v45 = vadd.f32 %v1932_v43, %v1305_v26  ;;  %v1299_v47 = vmul.f32 %v1291_v27, %v1244_v38 }
 0x42f   : > { %1322 = vst.msk [vmem:[%s2306_s12 + $0x58] sm:$0xff] %vm229_vm0, %v1314_v37  ;;  %v1308_v48 = vmul.f32 %v1300_v8, %v2298_v58 }
 0x430   : > { %1321 = vst.msk [vmem:[%s2306_s12 + $0x50] sm:$0xff] %vm229_vm0, %v1313_v45  ;;  %v1307_v50 = vmul.f32 %v1299_v47, %v2298_v58  ;;  %v1686_v10 = vpop.f32.mrb[30].mxu0 }
 0x431   : > { %v1316_v55 = vadd.f32 %v1933_v23, %v1308_v48  ;;  %v1302_v57 = vmul.f32 %v1686_v10, %v1294_v11  ;;  %v1254_v13 = vpop.f32.mrb[31].mxu0 }
 0x432   : > { %v1315_v12 = vadd.f32 %v1934_v60, %v1307_v50  ;;  %v1301_v63 = vmul.f32 %v1293_v52, %v1254_v13 }
 0x433   : > { %1324 = vst.msk [vmem:[%s2306_s12 + $0x68] sm:$0xff] %vm229_vm0, %v1316_v55  ;;  %v1310_v25 = vmul.f32 %v1302_v57, %v2298_v58 }
 0x434   : > { %1323 = vst.msk [vmem:[%s2306_s12 + $0x60] sm:$0xff] %vm229_vm0, %v1315_v12  ;;  %v1309_v0 = vmul.f32 %v1301_v63, %v2298_v58 }
 0x435   : > { %v1318_v28 = vadd.f32 %v1935_v1, %v1310_v25 }
 0x436   : > { %v1317_v3 = vadd.f32 %v1936_v53, %v1309_v0 }
 0x437   : > { %1326 = vst.msk [vmem:[%s2306_s12 + $0x78] sm:$0xff] %vm229_vm0, %v1318_v28 }
 0x438   : > { %1325 = vst.msk [vmem:[%s2306_s12 + $0x70] sm:$0xff] %vm229_vm0, %v1317_v3 }
 0x439 PF: > { %s15_s17 = sadd.s32 1, %s1943_s17  }
 0x43a   : > { %p12_p4 = scmp.ge.s32.totalorder %s15_s17, 4  }
 0x43c   :  { %14 = sbr.rel (!%p12_p4) target bundleno = 2 (0x2), region = 66 }

</bundles_post_ra>
